<compile_context>
chip_gen: v5e
topology: v5e:2x2
jax: 0.10.0
libtpu: 0.0.40
codegen_flags: <defaults>
</compile_context>

<pallas_src>
import jax
import jax.numpy as jnp
from jax.experimental import pallas as pl
from jax.experimental.pallas import tpu as pltpu


# ----------------------------------------------------------------------------
# Pallas kernel: one lane-dense matmul  Out_flat = X_flat @ KT
# ----------------------------------------------------------------------------
def _congruence_kernel(kt_ref, x_ref, o_ref):
    # x_ref: (TB, n²) bf16, kt_ref: (n², n²) bf16 -> o_ref: (TB, n²) f32
    o_ref[...] = jnp.dot(
        x_ref[...], kt_ref[...], preferred_element_type=jnp.float32
    )


def _round_up(x, m):
    return ((x + m - 1) // m) * m


def _kt_block_spec(n2):
    # KT never changes block index: single-buffer it (saves one VMEM buffer and
    # makes the "no per-step re-fetch" guarantee explicit).  Fall back cleanly
    # on jax versions whose BlockSpec lacks the pipeline_mode kwarg.
    try:
        return pl.BlockSpec((n2, n2), lambda i: (0, 0), pipeline_mode=pl.Buffered(1))
    except TypeError:  # pragma: no cover
        return pl.BlockSpec((n2, n2), lambda i: (0, 0))


def _batched_congruence(A, Xb, tile_b=4096):
    """Out[b] = A @ Xb[b] @ A^T for Xb of shape (B, n, n), via K = A ⊗ A.

    Intended for the small n typical of SPDNet layers (n <= ~16 keeps the
    FLOP inflation of the Kronecker trick comfortably on the HBM roofline;
    re-check the roofline before using n >= 32 on v5e).
    """
    B, n, _ = Xb.shape
    n2 = n * n

    # bf16 operands (see header note); accumulation / output stay f32.
    X_flat = Xb.reshape(B, n2).astype(jnp.bfloat16)          # row-major flatten
    # Row-major vec convention: Out_flat = X_flat @ (A ⊗ A)^T = X_flat @ kron(A^T, A^T)
    KT = jnp.kron(A.T, A.T).astype(jnp.bfloat16)             # (n², n²)

    # Batch-tile selection:
    #   * small B: one full block (full-dim exception to the (8,128) rule).
    #   * large B: at least two ~equal 8-aligned blocks so "parallel" semantics
    #     can shard the grid across both v7x TensorCores, capped at tile_b.
    if B <= 1024:
        TB = B
    else:
        TB = min(tile_b, _round_up(-(-B // 2), 8))
    grid = pl.cdiv(B, TB)

    # VMEM budget from actual need: 2×(X tile bf16) + 2×(out tile f32) + 1×KT,
    # with ~50% headroom + 4 MiB slack for Mosaic internal scratch.
    need_bytes = 2 * (TB * n2 * 2 + TB * n2 * 4) + n2 * n2 * 2
    vmem_limit = min(int(need_bytes * 1.5) + (4 << 20), 48 << 20)

    out = pl.pallas_call(
        _congruence_kernel,
        out_shape=jax.ShapeDtypeStruct((B, n2), jnp.float32),
        grid_spec=pltpu.PrefetchScalarGridSpec(
            num_scalar_prefetch=0,
            grid=(grid,),
            in_specs=[
                _kt_block_spec(n2),                          # KT, stationary
                pl.BlockSpec((TB, n2), lambda i: (i, 0)),    # X tile (lane-dense)
            ],
            out_specs=pl.BlockSpec((TB, n2), lambda i: (i, 0)),
        ),
        compiler_params=pltpu.CompilerParams(
            dimension_semantics=("parallel",),               # shards across TCs on v7x
            vmem_limit_bytes=vmem_limit,
        ),
        cost_estimate=pl.CostEstimate(
            flops=2 * B * n2 * n2,
            transcendentals=0,
            bytes_accessed=B * n2 * (2 + 4) + n2 * n2 * 2,   # bf16 in, f32 out, bf16 KT
        ),
    )(KT, X_flat)
    return out.reshape(B, n, n)


# ----------------------------------------------------------------------------
# Parameter setup (plain JAX glue)
# ----------------------------------------------------------------------------
def _sym_pow(S, p):
    """Symmetric fractional matrix power via eigendecomposition (== PowerEig)."""
    w, V = jnp.linalg.eigh(S.astype(jnp.float32))
    w = jnp.maximum(w, 1e-12)
    return (V * (w ** p)) @ V.T


def init_batchnorm_spd_params(n, po=1.0):
    """Deterministic parameters, mirroring BatchNormSPD.__init__."""
    eye = jnp.eye(n, dtype=jnp.float32)
    weight = eye + jnp.diag(jnp.arange(1, n + 1, dtype=jnp.float32) * 1e-7)
    return dict(
        running_mean=eye,                               # eye(n)
        weight=weight,                                  # SPDParameter(eye + diag)
        M=eye,                                          # SPDParameter(eye)
        running_var=jnp.ones((n,), dtype=jnp.float32),  # ones(n)
        shift=jnp.ones((1,), dtype=jnp.float32),        # ones(1)
        eps=1e-5,
        momentum=0.1,
        po=po,
    )


def _build_transform(params):
    """A = M^{1/2} w^{1/2} D^{1/2} mean^{-1/2} M^{-1/2}.

    Derivation of the eval-mode forward (po == 1):
        X'  = M^{-1/2} X M^{-1/2}                    CongrG(.., M, 'neg')
        Xc  = mean^{-1/2} X' mean^{-1/2}             pal1(mean, LogG(X', mean))
        Xs  = D^{1/2} Xc D^{1/2}                     scale1 (D = diag(shift/sqrt(var+eps)))
        Xn  = w^{1/2} Xs w^{1/2}                     ExpG(pal2(w, LogG1(Xs)), w)
        Out = M^{1/2} Xn M^{1/2}                     CongrG(.., M, 'pos')
    """
    po = params["po"]
    # TODO(synk): general po != 1 requires a per-sample PowerEig (batched
    # eigendecomposition); only po == 1 (the module default) is implemented.
    assert po == 1.0, "only po == 1 (module default) is implemented"

    M = params["M"]
    M_sqrt = _sym_pow(M, 0.5)
    M_isqrt = _sym_pow(M, -0.5)

    w = _sym_pow(params["weight"], po)          # PowerEig(weight, po)
    w = M_isqrt @ w @ M_isqrt                   # CongrG1(weight, M, 'neg')
    w_sqrt = _sym_pow(w, 0.5)

    mean_isqrt = _sym_pow(params["running_mean"], -0.5)

    # TODO(synk): exact repo-specific functional.scale1 / cal_var semantics are
    # unavailable; modelled as the diagonal congruence
    # D = diag(shift / sqrt(running_var + eps)).
    s = params["shift"] / jnp.sqrt(params["running_var"] + params["eps"])
    D_half = jnp.diag(jnp.sqrt(s))

    A = M_sqrt @ w_sqrt @ D_half @ mean_isqrt @ M_isqrt
    return A


def batchnorm_spd_forward(params, X):
    """Inference-mode forward of BatchNormSPD.  X: (N, h, n, n) SPD matrices."""
    # TODO(synk): training-mode branch (BaryGeom Karcher mean, cal_var,
    # geodesic running-stat updates) is not implemented; eval path only.
    N, h, n, _ = X.shape
    A = _build_transform(params)
    Xb = X.reshape(N * h, n, n)                 # matches the permute/view chain
    out = _batched_congruence(A, Xb)
    return out.reshape(N, h, n, n)


# ----------------------------------------------------------------------------
if __name__ == "__main__":
    key = jax.random.PRNGKey(0)
    N, h, n = 2, 4, 16

    # Deterministic batch of SPD matrices: X = G G^T + 0.5 I
    G = jax.random.normal(key, (N, h, n, n), dtype=jnp.float32)
    X = jnp.einsum("nhij,nhkj->nhik", G, G) + 0.5 * jnp.eye(n, dtype=jnp.float32)

    params = init_batchnorm_spd_params(n, po=1.0)

    out = jax.block_until_ready(batchnorm_spd_forward(params, X))

    # Plain-JAX reference of the same math (sanity check of the Pallas kernel).
    # Tolerance accounts for the bf16 MXU operand rounding (the f32 einsum on
    # TPU at DEFAULT precision rounds to bf16 internally as well).
    A = _build_transform(params)
    ref = jnp.einsum("ij,nhjk,lk->nhil", A, X, A)
    if not jnp.allclose(out, ref, atol=2e-2, rtol=2e-2):
        raise AssertionError("Pallas kernel output mismatch vs JAX reference")

    print("KERNEL_OK")
</pallas_src>

<mosaic_0001>
module attributes {stable_mosaic.version = 11 : i64} {
  func.func @_congruence_kernel(%arg0: i32, %arg1: memref<256x256xbf16, #tpu.memory_space<vmem>>, %arg2: memref<8x256xbf16, #tpu.memory_space<vmem>>, %arg3: memref<8x256xf32, #tpu.memory_space<vmem>>) attributes {dimension_semantics = [#tpu.dimension_semantics<parallel>], iteration_bounds = array<i64: 1>, scalar_prefetch = 0 : i64, scratch_operands = 0 : i64, tpu.core_type = #tpu.core_type<tc>, window_params = [{pipeline_mode = #tpu.pipeline_mode<synchronous>, transform_indices = @transform_0, window_bounds = array<i64: 256, 256>}, {transform_indices = @transform_1, window_bounds = array<i64: 8, 256>}, {transform_indices = @transform_2, window_bounds = array<i64: 8, 256>}]} {
    %c0 = arith.constant 0 : index
    %c0_0 = arith.constant 0 : index
    %0 = vector.load %arg2[%c0, %c0_0] : memref<8x256xbf16, #tpu.memory_space<vmem>>, vector<8x256xbf16>
    %c0_1 = arith.constant 0 : index
    %c0_2 = arith.constant 0 : index
    %1 = vector.load %arg1[%c0_1, %c0_2] : memref<256x256xbf16, #tpu.memory_space<vmem>>, vector<256x256xbf16>
    %cst = arith.constant dense<0.000000e+00> : vector<8x256xf32>
    %2 = tpu.matmul %0, %1, %cst {dimension_numbers = #tpu.dot_dimension_numbers<[1], [0], [0], [1], [0, 0, 1, 1], [], []>} : vector<8x256xbf16>, vector<256x256xbf16>, vector<8x256xf32> -> vector<8x256xf32>
    %c0_3 = arith.constant 0 : index
    %c0_4 = arith.constant 0 : index
    %3 = vector.load %arg3[%c0_3, %c0_4] : memref<8x256xf32, #tpu.memory_space<vmem>>, vector<8x256xf32>
    tpu.vector_store %arg3[%c0_3, %c0_4], %2 {strides = array<i32>} : memref<8x256xf32, #tpu.memory_space<vmem>>, vector<8x256xf32>,
    return
  }
  func.func @transform_0(%arg0: i32) -> (i32, i32) {
    %c0_i32 = arith.constant 0 : i32
    %c0_i32_0 = arith.constant 0 : i32
    %c0_i32_1 = arith.constant 0 : i32
    return %c0_i32, %c0_i32_0 : i32, i32
  }
  func.func @transform_1(%arg0: i32) -> (i32, i32) {
    %c0_i32 = arith.constant 0 : i32
    %c0_i32_0 = arith.constant 0 : i32
    return %arg0, %c0_i32 : i32, i32
  }
  func.func @transform_2(%arg0: i32) -> (i32, i32) {
    %c0_i32 = arith.constant 0 : i32
    %c0_i32_0 = arith.constant 0 : i32
    return %arg0, %c0_i32 : i32, i32
  }
}

</mosaic_0001>

<bundles_post_ra>
// kernel: tpu_custom_call.1
= control target key start
LH: loop header
LB: loop body
LE: loop exit
PB: predicated region body
PF: predicated region fallthrough
CT: control target
= control target key end

     0   :  { %7 = vsyncpa [#allocation3], 0  ;;  %s586_s0 = inlined_call_operand.hbm [shape: bf16[256,256], index: 0, kind: input, shape index: {}]   ;;  %s587_s1 = inlined_call_operand.hbm [shape: bf16[8,256], index: 1, kind: input, shape index: {}]   ;;  %s588_s2 = inlined_call_operand.hbm [shape: f32[8,256], index: 2, kind: output, shape index: {}]  }
   0x1   :  { %8 = vsyncpa [#allocation6], 0 }
   0x2   :  { %9 = vsyncpa [#allocation4], 0  ;;  %s14_s11 = sshll.u32 %s586_s0, 4  ;;  %s557_s12 = smov [#allocation2]   ;;  %s15_s11 = int_to_ptr.hbm [resolvable:$true] %s14_s11 }
   0x3   :  { %s16_s13 = sshll.u32 %s557_s12, 4  ;;  %s28_s16 = sshll.u32 %s587_s1, 4  ;;  %s17_s13 = int_to_ptr.vmem [resolvable:$true] %s16_s13  ;;  %s29_s16 = int_to_ptr.hbm [resolvable:$true] %s28_s16 }
   0x4   :  { %s558_s17 = smov 128   ;;  %s559_s18 = smov 8  }
   0x5   :  { %22 = dma.hbm_to_vmem [thread:$0]  %s15_s11, 4096, %s17_s13, [#allocation3], %s558_s17, %s558_s17, %s559_s18  }
   0x6   :  { %s560_s19 = smov [#allocation5]  }
   0x7   :  { %s30_s20 = sshll.u32 %s560_s19, 4  ;;  %s31_s20 = int_to_ptr.vmem [resolvable:$true] %s30_s20 }
   0x8   :  { %33 = dma.hbm_to_vmem [thread:$0]  %s29_s16, 128, %s31_s20, [#allocation6]  }
   0x9   :  { %551 = dma.done.wait [#allocation3], 4096  }
   0xa   :  { %552 = vsyncadd [#allocation3], 4294963200 }
   0xb   :  { %553 = dma.done.wait [#allocation6], 128  }
   0xc   :  { %554 = vsyncadd [#allocation6], 4294967168  ;;  %v372_v0 = vld [vmem:[#allocation2 + $0x70] sm:$0xf]  ;;  %v457_v1 = vld [vmem:[#allocation2 + $0x74] sm:$0xf0] }
   0xd   :  { %v436_v2 = vld [vmem:[#allocation2 + $0xf0] sm:$0xf]  ;;  %v373_v3 = vor.u32 %v457_v1, %v372_v0  ;;  %v473_v4 = vld [vmem:[#allocation2 + $0xf4] sm:$0xf0]  ;;  %v456_v5 = vld [vmem:[#allocation2 + $0x74] sm:$0xf] }
   0xe   :  { %v374_v6 = vld [vmem:[#allocation2 + $0x78] sm:$0xf0]  ;;  %v437_v7 = vor.u32 %v473_v4, %v436_v2  ;;  %v472_v9 = vld [vmem:[#allocation2 + $0xf4] sm:$0xf]  ;;  %v364_v11 = vld [vmem:[#allocation2 + $0x60] sm:$0xf] }
   0xf   :  { %v377_v8 = vor.u32 %v456_v5, %v374_v6  ;;  %v438_v10 = vld [vmem:[#allocation2 + $0xf8] sm:$0xf0]  ;;  %242 = vmatpush.bf16.msra.mxu0 %v373_v3  ;;  %v455_v13 = vld [vmem:[#allocation2 + $0x64] sm:$0xf0]  ;;  %v428_v14 = vld [vmem:[#allocation2 + $0xe0] sm:$0xf] }
  0x10   :  { %v441_v12 = vor.u32 %v472_v9, %v438_v10  ;;  %v471_v15 = vld [vmem:[#allocation2 + $0xe4] sm:$0xf0]  ;;  %255 = vmatpush.bf16.msra.mxu1 %v437_v7  ;;  %v365_v16 = vor.u32 %v455_v13, %v364_v11  ;;  %v454_v18 = vld [vmem:[#allocation2 + $0x64] sm:$0xf]  ;;  %v366_v19 = vld [vmem:[#allocation2 + $0x68] sm:$0xf0] }
  0x11   :  { %268 = vmatpush.bf16.msra.mxu2 %v377_v8  ;;  %v429_v17 = vor.u32 %v471_v15, %v428_v14  ;;  %v470_v20 = vld [vmem:[#allocation2 + $0xe4] sm:$0xf]  ;;  %v369_v21 = vor.u32 %v454_v18, %v366_v19  ;;  %v430_v22 = vld [vmem:[#allocation2 + $0xe8] sm:$0xf0]  ;;  %v356_v23 = vld [vmem:[#allocation2 + $0x50] sm:$0xf] }
  0x12   :  { %281 = vmatpush.bf16.msra.mxu3 %v441_v12  ;;  %v453_v24 = vld [vmem:[#allocation2 + $0x54] sm:$0xf0]  ;;  %v433_v25 = vor.u32 %v470_v20, %v430_v22  ;;  %v420_v26 = vld [vmem:[#allocation2 + $0xd0] sm:$0xf]  ;;  %v452_v28 = vld [vmem:[#allocation2 + $0x54] sm:$0xf] }
  0x13   :  { %v469_v27 = vld [vmem:[#allocation2 + $0xd4] sm:$0xf0]  ;;  %243 = vmatpush.bf16.msra.mxu0 %v365_v16  ;;  %v357_v29 = vor.u32 %v453_v24, %v356_v23  ;;  %v358_v30 = vld [vmem:[#allocation2 + $0x58] sm:$0xf0]  ;;  %v468_v31 = vld [vmem:[#allocation2 + $0xd4] sm:$0xf] }
  0x14   :  { %v422_v32 = vld [vmem:[#allocation2 + $0xd8] sm:$0xf0]  ;;  %256 = vmatpush.bf16.msra.mxu1 %v429_v17  ;;  %v421_v33 = vor.u32 %v469_v27, %v420_v26  ;;  %v361_v34 = vor.u32 %v452_v28, %v358_v30  ;;  %v348_v35 = vld [vmem:[#allocation2 + $0x40] sm:$0xf]  ;;  %v451_v36 = vld [vmem:[#allocation2 + $0x44] sm:$0xf0] }
  0x15   :  { %269 = vmatpush.bf16.msra.mxu2 %v369_v21  ;;  %v412_v37 = vld [vmem:[#allocation2 + $0xc0] sm:$0xf]  ;;  %v425_v38 = vor.u32 %v468_v31, %v422_v32  ;;  %v467_v39 = vld [vmem:[#allocation2 + $0xc4] sm:$0xf0]  ;;  %v450_v40 = vld [vmem:[#allocation2 + $0x44] sm:$0xf]  ;;  %v349_v44 = vor.u32 %v451_v36, %v348_v35 }
  0x16   :  { %282 = vmatpush.bf16.msra.mxu3 %v433_v25  ;;  %v350_v41 = vld [vmem:[#allocation2 + $0x48] sm:$0xf0]  ;;  %v466_v42 = vld [vmem:[#allocation2 + $0xc4] sm:$0xf]  ;;  %v413_v45 = vor.u32 %v467_v39, %v412_v37  ;;  %v340_v47 = vld [vmem:[#allocation2 + $0x30] sm:$0xf] }
  0x17   :  { %v414_v43 = vld [vmem:[#allocation2 + $0xc8] sm:$0xf0]  ;;  %244 = vmatpush.bf16.msra.mxu0 %v357_v29  ;;  %v353_v46 = vor.u32 %v450_v40, %v350_v41  ;;  %v449_v48 = vld [vmem:[#allocation2 + $0x34] sm:$0xf0]  ;;  %v404_v49 = vld [vmem:[#allocation2 + $0xb0] sm:$0xf] }
  0x18   :  { %257 = vmatpush.bf16.msra.mxu1 %v421_v33  ;;  %v417_v50 = vor.u32 %v466_v42, %v414_v43  ;;  %v465_v51 = vld [vmem:[#allocation2 + $0xb4] sm:$0xf0]  ;;  %v448_v52 = vld [vmem:[#allocation2 + $0x34] sm:$0xf]  ;;  %v342_v53 = vld [vmem:[#allocation2 + $0x38] sm:$0xf0]  ;;  %v341_v56 = vor.u32 %v449_v48, %v340_v47 }
  0x19   :  { %270 = vmatpush.bf16.msra.mxu2 %v361_v34  ;;  %v464_v54 = vld [vmem:[#allocation2 + $0xb4] sm:$0xf]  ;;  %v406_v55 = vld [vmem:[#allocation2 + $0xb8] sm:$0xf0]  ;;  %v405_v57 = vor.u32 %v465_v51, %v404_v49  ;;  %v345_v58 = vor.u32 %v448_v52, %v342_v53  ;;  %v332_v59 = vld [vmem:[#allocation2 + $0x20] sm:$0xf] }
  0x1a   :  { %283 = vmatpush.bf16.msra.mxu3 %v425_v38  ;;  %v447_v60 = vld [vmem:[#allocation2 + $0x24] sm:$0xf0]  ;;  %v396_v61 = vld [vmem:[#allocation2 + $0xa0] sm:$0xf]  ;;  %v409_v62 = vor.u32 %v464_v54, %v406_v55  ;;  %v446_v0 = vld [vmem:[#allocation2 + $0x24] sm:$0xf] }
  0x1b   :  { %245 = vmatpush.bf16.msra.mxu0 %v349_v44  ;;  %v463_v63 = vld [vmem:[#allocation2 + $0xa4] sm:$0xf0]  ;;  %v334_v1 = vld [vmem:[#allocation2 + $0x28] sm:$0xf0]  ;;  %v462_v2 = vld [vmem:[#allocation2 + $0xa4] sm:$0xf]  ;;  %v333_v4 = vor.u32 %v447_v60, %v332_v59 }
  0x1c   :  { %258 = vmatpush.bf16.msra.mxu1 %v413_v45  ;;  %v398_v3 = vld [vmem:[#allocation2 + $0xa8] sm:$0xf0]  ;;  %v397_v5 = vor.u32 %v463_v63, %v396_v61  ;;  %v337_v6 = vor.u32 %v446_v0, %v334_v1  ;;  %v324_v7 = vld [vmem:[#allocation2 + $0x10] sm:$0xf]  ;;  %v445_v8 = vld [vmem:[#allocation2 + $0x14] sm:$0xf0] }
  0x1d   :  { %271 = vmatpush.bf16.msra.mxu2 %v353_v46  ;;  %v388_v9 = vld [vmem:[#allocation2 + $0x90] sm:$0xf]  ;;  %v401_v10 = vor.u32 %v462_v2, %v398_v3  ;;  %v461_v11 = vld [vmem:[#allocation2 + $0x94] sm:$0xf0]  ;;  %v444_v12 = vld [vmem:[#allocation2 + $0x14] sm:$0xf]  ;;  %v325_v16 = vor.u32 %v445_v8, %v324_v7 }
  0x1e   :  { %284 = vmatpush.bf16.msra.mxu3 %v417_v50  ;;  %v326_v13 = vld [vmem:[#allocation2 + $0x18] sm:$0xf0]  ;;  %v460_v14 = vld [vmem:[#allocation2 + $0x94] sm:$0xf]  ;;  %v42_v17 = vld [vmem:[#allocation5] sm:$0xff]  ;;  %v389_v18 = vor.u32 %v461_v11, %v388_v9  ;;  %s561_s0 = smov [#allocation7]  }
  0x1f   :  { %246 = vmatpush.bf16.msra.mxu0 %v341_v56  ;;  %v390_v15 = vld [vmem:[#allocation2 + $0x98] sm:$0xf0]  ;;  %v329_v19 = vor.u32 %v444_v12, %v326_v13  ;;  %v316_v20 = vld [vmem:[#allocation2] sm:$0xf]  ;;  %v443_v21 = vld [vmem:[#allocation2 + $0x4] sm:$0xf0]  ;;  %v76_v29 = vunpack.c.l.b16 %v42_v17  ;;  %v77_v31 = vunpack.c.h.b16 %v42_v17 }
  0x20   :  { %259 = vmatpush.bf16.msra.mxu1 %v405_v57  ;;  %v380_v22 = vld [vmem:[#allocation2 + $0x80] sm:$0xf]  ;;  %v393_v23 = vor.u32 %v460_v14, %v390_v15  ;;  %v459_v24 = vld [vmem:[#allocation2 + $0x84] sm:$0xf0]  ;;  %v442_v25 = vld [vmem:[#allocation2 + $0x4] sm:$0xf]  ;;  %v317_v30 = vor.u32 %v443_v21, %v316_v20 }
  0x21   :  { %272 = vmatpush.bf16.msra.mxu2 %v345_v58  ;;  %v318_v26 = vld [vmem:[#allocation2 + $0x8] sm:$0xf0]  ;;  %v458_v27 = vld [vmem:[#allocation2 + $0x84] sm:$0xf]  ;;  %v381_v32 = vor.u32 %v459_v24, %v380_v22  ;;  %v78_v35 = vpack.c.b16 %v76_v29, %v76_v29  ;;  %v79_v36 = vpack.c.b16 %v77_v31, %v77_v31  ;;  %s301_s1 = sshll.u32 %s561_s0, 4  ;;  %s303_s23 = sshll.u32 %s588_s2, 4  ;;  %s302_s1 = int_to_ptr.vmem [resolvable:$true] %s301_s1  ;;  %s304_s23 = int_to_ptr.hbm [resolvable:$true] %s303_s23 }
  0x22   :  { %285 = vmatpush.bf16.msra.mxu3 %v409_v62  ;;  %v382_v28 = vld [vmem:[#allocation2 + $0x88] sm:$0xf0]  ;;  %v321_v33 = vor.u32 %v442_v25, %v318_v26 }
  0x23   :  { %247 = vmatpush.bf16.msra.mxu0 %v333_v4  ;;  %v385_v34 = vor.u32 %v458_v27, %v382_v28 }
  0x24   :  { %260 = vmatpush.bf16.msra.mxu1 %v397_v5 }
  0x25   :  { %273 = vmatpush.bf16.msra.mxu2 %v337_v6 }
  0x26   :  { %286 = vmatpush.bf16.msra.mxu3 %v401_v10 }
  0x27   :  { %248 = vmatpush.bf16.msra.mxu0 %v325_v16 }
  0x28   :  { %261 = vmatpush.bf16.msra.mxu1 %v389_v18 }
  0x29   :  { %274 = vmatpush.bf16.msra.mxu2 %v329_v19 }
  0x2a   :  { %287 = vmatpush.bf16.msra.mxu3 %v393_v23 }
  0x2b   :  { %249 = vmatpush.bf16.msra.mxu0 %v317_v30 }
  0x2c   :  { %262 = vmatpush.bf16.msra.mxu1 %v381_v32 }
  0x2d   :  { %275 = vmatpush.bf16.msra.mxu2 %v321_v33 }
  0x2e   :  { %288 = vmatpush.bf16.msra.mxu3 %v385_v34  ;;  %250 = vmatmul.bf16.vlgmr.msra.gmra.mxu0 %v78_v35 }
  0x2f   :  { %263 = vmatmul.bf16.vlgmr.msra.gmra.mxu1 %v79_v36 }
  0x30   :  { %276 = vmatmul.bf16.vlgmr.msra.gmra.mxu2 %v78_v35 }
  0x31   :  { %289 = vmatmul.bf16.vlgmr.msra.gmra.mxu3 %v79_v36 }
  0xab   :  { %v251_v37 = vpop.f32.mrf.mxu0 }
  0xac   :  { %v264_v38 = vpop.f32.mrf.mxu1 }
  0xad   :  { %v265_v39 = vadd.f32 %v264_v38, %v251_v37 }
  0xaf   :  { %294 = vst [vmem:[#allocation7] sm:$0xff] %v265_v39 }
  0xb3   :  { %v277_v40 = vpop.f32.mrf.mxu2  ;;  %v253_v42 = vpop.f32.mrf.mxu0 }
  0xb4   :  { %v290_v41 = vpop.f32.mrf.mxu3  ;;  %v266_v44 = vpop.f32.mrf.mxu1 }
  0xb5   :  { %v291_v43 = vadd.f32 %v290_v41, %v277_v40 }
  0xb7   :  { %295 = vst [vmem:[#allocation7 + $0x8] sm:$0xff] %v291_v43 }
  0xb8   :  { %306 = dma.vmem_to_hbm [thread:$0]  %s302_s1, 256, %s304_s23, [#allocation4]  }
  0xbb   :  { %v279_v45 = vpop.f32.mrf.mxu2 }
  0xbc   :  { %v292_v46 = vpop.f32.mrf.mxu3 }
  0xbd   :  { %555 = dma.done.wait [#allocation4], 256  }
  0xbe   :  { %556 = vsyncadd [#allocation4], 4294967040 }
  0xbf   :  { %311 = vsyncpa [#allocation3], 1 }
  0xc0   :  { %312 = vsyncpa [#allocation6], 1 }
  0xc1   :  { %313 = vsyncpa [#allocation4], 1 }

</bundles_post_ra>
